<compile_context>
chip_gen: v7x
topology: tpu7x:2x2x1
jax: 0.10.0
libtpu: 0.0.40
codegen_flags: <defaults>
</compile_context>

<pallas_src>
import functools

import jax
import jax.numpy as jnp
from jax.experimental import pallas as pl
from jax.experimental.pallas import tpu as pltpu


def _is_split_kernel(x_ref, out_ref, py_acc, plogp_acc, *,
                     split_size, block_rows, mask_rows):
    """One (split, row-chunk) grid step of the Inception-Score computation."""
    r = pl.program_id(1)
    last = pl.num_programs(1) - 1

    @pl.when(r == 0)
    def _init():
        py_acc[...] = jnp.zeros_like(py_acc)
        plogp_acc[...] = jnp.zeros_like(plogp_acc)

    x = x_ref[0].astype(jnp.float32)                      # (TB, C) logits, f32

    if mask_rows:
        # Partial tail chunk: rows past split_size hold undefined data. Zero the
        # logits (-> finite uniform softmax) and drop their contributions below.
        row_ids = r * block_rows + jax.lax.broadcasted_iota(
            jnp.int32, (block_rows, 1), 0)
        row_valid = row_ids < split_size                  # (TB, 1)
        x = jnp.where(row_valid, x, 0.0)

    # Numerically-stable softmax over the class (lane) axis; Mosaic masks the
    # non-128-aligned lane padding inside the reductions.
    m = jnp.max(x, axis=-1, keepdims=True)                # (TB, 1)
    z = x - m
    e = jnp.exp(z)
    s_row = jnp.sum(e, axis=-1, keepdims=True)            # (TB, 1)
    ez_row = jnp.sum(e * z, axis=-1, keepdims=True)       # (TB, 1)
    inv_s = pl.reciprocal(s_row, approx=False)            # one reciprocal / row
    log_s = jnp.log(s_row)
    # sum_c p*log p  =  (sum_c e*z)/s - log s             (uses sum_c p == 1)
    plogp_row = ez_row * inv_s - log_s                    # (TB, 1)
    p = e * inv_s                                         # (TB, C)

    if mask_rows:
        py_partial = jnp.sum(jnp.where(row_valid, p, 0.0), axis=0, keepdims=True)
        plogp_partial = jnp.sum(jnp.where(row_valid, plogp_row, 0.0))
    else:
        py_partial = jnp.sum(p, axis=0, keepdims=True)    # (1, C)
        plogp_partial = jnp.sum(plogp_row)                # scalar

    py_acc[...] += py_partial
    plogp_acc[...] += plogp_partial

    @pl.when(r == last)
    def _finalize():
        inv_n = jnp.float32(1.0 / split_size)
        p_y = py_acc[...] * inv_n                         # (1, C)
        # A class with marginal probability exactly 0 contributes 0 (guards log(0)).
        safe_p_y = jnp.where(p_y > 0.0, p_y, 1.0)
        py_logpy = jnp.sum(p_y * jnp.log(safe_p_y), axis=-1, keepdims=True)  # (1, 1)
        # mean_k KL(p_k || p_y) = mean_k sum_c p*log p  -  sum_c p_y*log p_y
        kl = plogp_acc[...] * inv_n - py_logpy            # (1, 1)
        score = jnp.exp(kl)
        out_ref[...] = jnp.broadcast_to(score, out_ref.shape)


def inception_score_mean(prediction_features, target_features=None, *,
                         num_splits=5, block_rows=None):
    """JAX/Pallas equivalent of ISWrapper(num_splits).forward(pred, target).

    target_features is accepted but unused, matching the PyTorch module (IS is
    computed from prediction features only; only the mean is returned).
    """
    del target_features  # unused, as in ISWrapper.forward
    n, c = prediction_features.shape
    split_size = n // num_splits
    assert split_size > 0, "need at least num_splits rows"
    # piq drops the remainder rows when N is not divisible by num_splits.
    x = prediction_features[: split_size * num_splits]
    # Keep the HBM dtype (no wrapper astype/pad pass); upcast per tile in-kernel.
    # The class axis stays at its native (possibly non-128-aligned) extent.
    x = x.reshape(num_splits, split_size, c)

    # Row-chunk size: 512 keeps the double-buffered input block + f32
    # temporaries comfortably inside v7x's 64 MiB VMEM (32 MiB scoped default)
    # while reaching HBM roofline on v5e/v6e.
    if block_rows is None:
        block_rows = 512
    if block_rows >= split_size:
        tb = split_size                                   # single full-extent chunk
    else:
        tb = max(8, (block_rows // 8) * 8)                # streamed chunks: multiple of 8
        tb = min(tb, split_size)
    num_chunks = pl.cdiv(split_size, tb)
    mask_rows = (split_size % tb) != 0

    kernel = functools.partial(
        _is_split_kernel, split_size=split_size, block_rows=tb, mask_rows=mask_rows)

    n_used = num_splits * split_size
    cost = pl.CostEstimate(
        flops=8 * n_used * c,
        transcendentals=n_used * (c + 2),
        bytes_accessed=n_used * c * x.dtype.itemsize + num_splits * 8 * 128 * 4,
    )

    out = pl.pallas_call(
        kernel,
        out_shape=jax.ShapeDtypeStruct((num_splits, 8, 128), jnp.float32),
        grid_spec=pltpu.PrefetchScalarGridSpec(
            num_scalar_prefetch=0,
            grid=(num_splits, num_chunks),
            in_specs=[pl.BlockSpec((1, tb, c), lambda s, r: (s, r, 0))],
            out_specs=pl.BlockSpec((1, 8, 128), lambda s, r: (s, 0, 0)),
            scratch_shapes=[
                pltpu.VMEM((1, c), jnp.float32),   # running sum over rows of p
                pltpu.VMEM((1, 1), jnp.float32),   # running sum of per-row p*log p
            ],
        ),
        compiler_params=pltpu.CompilerParams(
            dimension_semantics=("parallel", "arbitrary")),
        cost_estimate=cost,
    )(x)
    # Per-split scores live at [:, 0, 0]; ISWrapper returns their mean only.
    return jnp.mean(out[:, 0, 0])


def _reference_is_mean(feats, num_splits):
    """Pure-JAX reference mirroring piq.inception_score (mean only)."""
    n, _ = feats.shape
    ss = n // num_splits
    probs = jax.nn.softmax(feats.astype(jnp.float32), axis=-1)
    scores = []
    for i in range(num_splits):
        sub = probs[i * ss:(i + 1) * ss]
        p_y = jnp.mean(sub, axis=0, keepdims=True)
        kl = jnp.sum(sub * (jnp.log(sub) - jnp.log(p_y)), axis=-1)
        scores.append(jnp.exp(jnp.mean(kl)))
    return jnp.mean(jnp.stack(scores))


if __name__ == "__main__":
    key = jax.random.PRNGKey(0)
    k1, k2 = jax.random.split(key)

    num_splits = 5
    # split_size = 120 // 5 = 24; C = 200 deliberately NOT a multiple of 128
    # (Mosaic handles the lane masking, no wrapper-side padding pass).
    N, C = 120, 200
    prediction_features = jax.random.normal(k1, (N, C), dtype=jnp.float32)
    target_features = jax.random.normal(k2, (N, C), dtype=jnp.float32)  # unused by IS

    # Exercise the streamed path: 24-row splits in 16-row chunks with a masked
    # 8-row tail chunk (multi-chunk accumulation + row masking).
    mean_is = inception_score_mean(
        prediction_features, target_features, num_splits=num_splits, block_rows=16)
    mean_is = jax.block_until_ready(mean_is)
    ref = _reference_is_mean(prediction_features, num_splits)
    assert jnp.allclose(mean_is, ref, rtol=1e-5, atol=1e-5), (mean_is, ref)

    # Exercise the single-chunk path with bf16 features resident in HBM
    # (halved HBM read bytes; in-kernel upcast to f32).
    pred_bf16 = prediction_features.astype(jnp.bfloat16)
    mean_is_bf16 = jax.block_until_ready(
        inception_score_mean(pred_bf16, target_features, num_splits=num_splits))
    ref_bf16 = _reference_is_mean(pred_bf16.astype(jnp.float32), num_splits)
    assert jnp.allclose(mean_is_bf16, ref_bf16, rtol=1e-4, atol=1e-4), (
        mean_is_bf16, ref_bf16)

    print("KERNEL_OK")
</pallas_src>

<mosaic_0001>
module attributes {stable_mosaic.version = 11 : i64} {
  func.func @_is_split_kernel(%arg0: i32, %arg1: i32, %arg2: memref<1x16x200xf32, #tpu.memory_space<vmem>>, %arg3: memref<1x8x128xf32, #tpu.memory_space<vmem>>, %arg4: memref<1x200xf32, #tpu.memory_space<vmem>>, %arg5: memref<1x1xf32, #tpu.memory_space<vmem>>) attributes {dimension_semantics = [#tpu.dimension_semantics<parallel>, #tpu.dimension_semantics<arbitrary>], iteration_bounds = array<i64: 5, 2>, scalar_prefetch = 0 : i64, scratch_operands = 2 : i64, tpu.core_type = #tpu.core_type<tc>, window_params = [{transform_indices = @transform_0, window_bounds = array<i64: 1, 16, 200>}, {transform_indices = @transform_1, window_bounds = array<i64: 1, 8, 128>}]} {
    %c0_i32 = arith.constant 0 : i32
    %0 = arith.cmpi eq, %arg1, %c0_i32 : i32
    %1 = arith.extui %0 : i1 to i32
    %c0_i32_0 = arith.constant 0 : i32
    %2 = arith.cmpi ne, %1, %c0_i32_0 : i32
    scf.if %2 {
      %cst_19 = arith.constant 0.000000e+00 : f32
      %53 = vector.broadcast %cst_19 : f32 to vector<1x200xf32>
      %c0_20 = arith.constant 0 : index
      %c0_21 = arith.constant 0 : index
      %54 = vector.load %arg4[%c0_20, %c0_21] : memref<1x200xf32, #tpu.memory_space<vmem>>, vector<1x200xf32>
      tpu.vector_store %arg4[%c0_20, %c0_21], %53 {strides = array<i32>} : memref<1x200xf32, #tpu.memory_space<vmem>>, vector<1x200xf32>,
      %cst_22 = arith.constant 0.000000e+00 : f32
      %55 = vector.broadcast %cst_22 : f32 to vector<1x1xf32>
      %c0_23 = arith.constant 0 : index
      %c0_24 = arith.constant 0 : index
      %56 = vector.load %arg5[%c0_23, %c0_24] : memref<1x1xf32, #tpu.memory_space<vmem>>, vector<1x1xf32>
      tpu.vector_store %arg5[%c0_23, %c0_24], %55 {strides = array<i32>} : memref<1x1xf32, #tpu.memory_space<vmem>>, vector<1x1xf32>,
    } else {
    }
    %c0 = arith.constant 0 : index
    %c0_1 = arith.constant 0 : index
    %c0_2 = arith.constant 0 : index
    %3 = vector.load %arg2[%c0, %c0_1, %c0_2] : memref<1x16x200xf32, #tpu.memory_space<vmem>>, vector<1x16x200xf32>
    %4 = vector.shape_cast %3 : vector<1x16x200xf32> to vector<16x200xf32>
    %c16_i32 = arith.constant 16 : i32
    %5 = arith.muli %arg1, %c16_i32 : i32
    %6 = tpu.iota {dimensions = array<i32: 0>} : vector<16x1xi32>
    %7 = vector.broadcast %5 : i32 to vector<16x1xi32>
    %8 = arith.addi %7, %6 : vector<16x1xi32>
    %c24_i32 = arith.constant 24 : i32
    %9 = vector.broadcast %c24_i32 : i32 to vector<16x1xi32>
    %10 = arith.cmpi slt, %8, %9 : vector<16x1xi32>
    %cst = arith.constant 0.000000e+00 : f32
    %11 = vector.shape_cast %10 : vector<16x1xi1> to vector<16x1xi1>
    %12 = vector.broadcast %11 : vector<16x1xi1> to vector<16x200xi1>
    %13 = vector.broadcast %cst : f32 to vector<16x200xf32>
    %14 = arith.select %12, %4, %13 : vector<16x200xi1>, vector<16x200xf32>
    %cst_3 = arith.constant dense<0xFF800000> : vector<16xf32>
    %15 = vector.multi_reduction <maximumf>, %14, %cst_3 [1] : vector<16x200xf32> to vector<16xf32>
    %16 = vector.shape_cast %15 : vector<16xf32> to vector<16x1xf32>
    %17 = vector.broadcast %16 : vector<16x1xf32> to vector<16x200xf32>
    %18 = arith.subf %14, %17 : vector<16x200xf32>
    %19 = math.exp %18 : vector<16x200xf32>
    %cst_4 = arith.constant dense<0.000000e+00> : vector<16xf32>
    %20 = vector.multi_reduction <add>, %19, %cst_4 [1] : vector<16x200xf32> to vector<16xf32>
    %21 = vector.shape_cast %20 : vector<16xf32> to vector<16x1xf32>
    %22 = arith.mulf %19, %18 : vector<16x200xf32>
    %cst_5 = arith.constant dense<0.000000e+00> : vector<16xf32>
    %23 = vector.multi_reduction <add>, %22, %cst_5 [1] : vector<16x200xf32> to vector<16xf32>
    %24 = vector.shape_cast %23 : vector<16xf32> to vector<16x1xf32>
    %25 = tpu.reciprocal %21 : vector<16x1xf32> -> vector<16x1xf32>
    %26 = math.log %21 : vector<16x1xf32>
    %27 = arith.mulf %24, %25 : vector<16x1xf32>
    %28 = arith.subf %27, %26 : vector<16x1xf32>
    %29 = vector.broadcast %25 : vector<16x1xf32> to vector<16x200xf32>
    %30 = arith.mulf %19, %29 : vector<16x200xf32>
    %cst_6 = arith.constant 0.000000e+00 : f32
    %31 = vector.shape_cast %10 : vector<16x1xi1> to vector<16x1xi1>
    %32 = vector.broadcast %31 : vector<16x1xi1> to vector<16x200xi1>
    %33 = vector.broadcast %cst_6 : f32 to vector<16x200xf32>
    %34 = arith.select %32, %30, %33 : vector<16x200xi1>, vector<16x200xf32>
    %cst_7 = arith.constant dense<0.000000e+00> : vector<200xf32>
    %35 = vector.multi_reduction <add>, %34, %cst_7 [0] : vector<16x200xf32> to vector<200xf32>
    %36 = vector.shape_cast %35 : vector<200xf32> to vector<1x200xf32>
    %cst_8 = arith.constant 0.000000e+00 : f32
    %37 = vector.broadcast %cst_8 : f32 to vector<16x1xf32>
    %38 = arith.select %10, %28, %37 : vector<16x1xi1>, vector<16x1xf32>
    %39 = vector.shape_cast %38 : vector<16x1xf32> to vector<1x16x1xf32>
    %cst_9 = arith.constant dense<0.000000e+00> : vector<1xf32>
    %40 = vector.multi_reduction <add>, %39, %cst_9 [1, 2] : vector<1x16x1xf32> to vector<1xf32>
    %41 = vector.shape_cast %40 : vector<1xf32> to vector<1x1x1xf32>
    %42 = vector.extract %41[0, 0, 0] : f32 from vector<1x1x1xf32>
    %c0_10 = arith.constant 0 : index
    %c0_11 = arith.constant 0 : index
    %43 = vector.load %arg4[%c0_10, %c0_11] : memref<1x200xf32, #tpu.memory_space<vmem>>, vector<1x200xf32>
    %44 = arith.addf %43, %36 : vector<1x200xf32>
    %c0_12 = arith.constant 0 : index
    %c0_13 = arith.constant 0 : index
    %45 = vector.load %arg4[%c0_12, %c0_13] : memref<1x200xf32, #tpu.memory_space<vmem>>, vector<1x200xf32>
    tpu.vector_store %arg4[%c0_12, %c0_13], %44 {strides = array<i32>} : memref<1x200xf32, #tpu.memory_space<vmem>>, vector<1x200xf32>,
    %c0_14 = arith.constant 0 : index
    %c0_15 = arith.constant 0 : index
    %46 = vector.load %arg5[%c0_14, %c0_15] : memref<1x1xf32, #tpu.memory_space<vmem>>, vector<1x1xf32>
    %47 = vector.broadcast %42 : f32 to vector<1x1xf32>
    %48 = arith.addf %46, %47 : vector<1x1xf32>
    %c0_16 = arith.constant 0 : index
    %c0_17 = arith.constant 0 : index
    %49 = vector.load %arg5[%c0_16, %c0_17] : memref<1x1xf32, #tpu.memory_space<vmem>>, vector<1x1xf32>
    tpu.vector_store %arg5[%c0_16, %c0_17], %48 {strides = array<i32>} : memref<1x1xf32, #tpu.memory_space<vmem>>, vector<1x1xf32>,
    %c1_i32 = arith.constant 1 : i32
    %50 = arith.cmpi eq, %arg1, %c1_i32 : i32
    %51 = arith.extui %50 : i1 to i32
    %c0_i32_18 = arith.constant 0 : i32
    %52 = arith.cmpi ne, %51, %c0_i32_18 : i32
    scf.if %52 {
      %c0_19 = arith.constant 0 : index
      %c0_20 = arith.constant 0 : index
      %53 = vector.load %arg4[%c0_19, %c0_20] : memref<1x200xf32, #tpu.memory_space<vmem>>, vector<1x200xf32>
      %cst_21 = arith.constant 0.0416666679 : f32
      %54 = vector.broadcast %cst_21 : f32 to vector<1x200xf32>
      %55 = arith.mulf %53, %54 : vector<1x200xf32>
      %cst_22 = arith.constant 0.000000e+00 : f32
      %56 = vector.broadcast %cst_22 : f32 to vector<1x200xf32>
      %57 = arith.cmpf ogt, %55, %56 : vector<1x200xf32>
      %cst_23 = arith.constant 1.000000e+00 : f32
      %58 = vector.broadcast %cst_23 : f32 to vector<1x200xf32>
      %59 = arith.select %57, %55, %58 : vector<1x200xi1>, vector<1x200xf32>
      %60 = math.log %59 : vector<1x200xf32>
      %61 = arith.mulf %55, %60 : vector<1x200xf32>
      %cst_24 = arith.constant dense<0.000000e+00> : vector<1xf32>
      %62 = vector.multi_reduction <add>, %61, %cst_24 [1] : vector<1x200xf32> to vector<1xf32>
      %63 = vector.shape_cast %62 : vector<1xf32> to vector<1x1xf32>
      %c0_25 = arith.constant 0 : index
      %c0_26 = arith.constant 0 : index
      %64 = vector.load %arg5[%c0_25, %c0_26] : memref<1x1xf32, #tpu.memory_space<vmem>>, vector<1x1xf32>
      %cst_27 = arith.constant 0.0416666679 : f32
      %65 = vector.broadcast %cst_27 : f32 to vector<1x1xf32>
      %66 = arith.mulf %64, %65 : vector<1x1xf32>
      %67 = arith.subf %66, %63 : vector<1x1xf32>
      %68 = math.exp %67 : vector<1x1xf32>
      %69 = vector.shape_cast %68 : vector<1x1xf32> to vector<1x1x1xf32>
      %70 = vector.broadcast %69 : vector<1x1x1xf32> to vector<1x8x128xf32>
      %c0_28 = arith.constant 0 : index
      %c0_29 = arith.constant 0 : index
      %c0_30 = arith.constant 0 : index
      %71 = vector.load %arg3[%c0_28, %c0_29, %c0_30] : memref<1x8x128xf32, #tpu.memory_space<vmem>>, vector<1x8x128xf32>
      tpu.vector_store %arg3[%c0_28, %c0_29, %c0_30], %70 {strides = array<i32>} : memref<1x8x128xf32, #tpu.memory_space<vmem>>, vector<1x8x128xf32>,
    } else {
    }
    return
  }
  func.func @transform_0(%arg0: i32, %arg1: i32) -> (i32, i32, i32) {
    %c0_i32 = arith.constant 0 : i32
    %c0_i32_0 = arith.constant 0 : i32
    return %arg0, %arg1, %c0_i32 : i32, i32, i32
  }
  func.func @transform_1(%arg0: i32, %arg1: i32) -> (i32, i32, i32) {
    %c0_i32 = arith.constant 0 : i32
    %c0_i32_0 = arith.constant 0 : i32
    %c0_i32_1 = arith.constant 0 : i32
    return %arg0, %c0_i32, %c0_i32_0 : i32, i32, i32
  }
}

</mosaic_0001>

<bundles_post_ra>
// kernel: tpu_custom_call.1
= control target key start
LH: loop header
LB: loop body
LE: loop exit
PB: predicated region body
PF: predicated region fallthrough
CT: control target
= control target key end

     0   :  { %6 = vsyncpa [#allocation5], 0  ;;  %s1047_s0 = inlined_call_operand.hbm [shape: f32[5,24,200], index: 0, kind: input, shape index: {}]   ;;  %s1048_s1 = inlined_call_operand.hbm [shape: f32[5,8,128], index: 1, kind: output, shape index: {}]  }
   0x1   :  { %8 = vsyncpa [#allocation5 + $0x1], 0 }
   0x2   :  { %9 = vsyncpa [#allocation6], 0 }
   0x3   :  { %11 = vsyncpa [#allocation6 + $0x1], 0  ;;  %s778_s6 = smov 0   ;;  %s780_s7 = smov 0  }
   0x4   :  { %s782_s8 = smov 0   ;;  %s784_s9 = smov 0  }
   0x5   :  { %s786_s10 = smov 0   ;;  %s788_s11 = smov 0  }
   0x6   :  { %s790_s12 = smov 0   ;;  %s792_s13 = smov 0  }
   0x7   :  { %s794_s14 = smov 0   ;;  %s796_s15 = smov 0  }
   0x8   :  { %s798_s16 = smov 0  }
   0x9 LB: > { %s459_s17 = sadd.s32 4294967295, %s759_s16   ;;  %s460_s18 = sadd.s32 4294967294, %s759_s16   ;;  %s759_s16 = sphi %s798_s16, %s17_s16   ;;  %s755_s15 = sphi %s796_s15, %s1069_s15   ;;  %s751_s14 = sphi %s794_s14, %s1068_s14   ;;  %s747_s13 = sphi %s792_s13, %s1067_s13   ;;  %s743_s12 = sphi %s790_s12, %s1066_s12   ;;  %s739_s11 = sphi %s788_s11, %s1065_s11   ;;  %s735_s10 = sphi %s786_s10, %s1064_s10   ;;  %s731_s9 = sphi %s784_s9, %s1063_s9   ;;  %s727_s8 = sphi %s782_s8, %s1062_s8   ;;  %s723_s7 = sphi %s780_s7, %s1061_s7   ;;  %s719_s6 = sphi %s778_s6, %s1060_s6  }
   0xa   : > { %s26_s19 = sadd.s32 1, %s751_s14  ;;  %s29_s20 = sadd.s32 1, %s755_s15 }
   0xb   : > { %p27_p0 = scmp.ge.s32.totalorder %s26_s19, 2  ;;  %s38_s21 = sadd.s32 1, %s739_s11 }
   0xc   : > { %p45_p1 = scmp.ne.s32.totalorder %s739_s11, %s735_s10  ;;  %p46_p2 = scmp.eq.s32.totalorder %s759_s16, 0 }
   0xd   : > { %s1071_s19 = smov (%p27_p0, %s26_s19), 0  ;;  %s1073_s20 = smov (!%p27_p0, %s29_s20), %s755_s15 }
   0xe   : > { %1051 = sst [smem:[#allocation10_spill]] %s1071_s19  ;;  %s34_s22 = ssub.s32 %s751_s14, %s1071_s19 }
   0xf   : > { %p844_p3 = por %p46_p2, %p45_p1  ;;  %p31_p4 = scmp.ge.s32.totalorder %s1073_s20, 5 }
  0x10   : > { %p51_p5 = scmp.ne.s32.totalorder %s735_s10, %s731_s9  ;;  %p52_p6 = scmp.eq.s32.totalorder %s459_s17, 0 }
  0x11   : > { %s64_s24 = sadd.s32 1, %s727_s8  ;;  %s1075_s20 = smov (%p31_p4, %s1073_s20), 0 }
  0x12   : > { %1053 = sst [smem:[#allocation11_spill]] %s1075_s20  ;;  %p852_p7 = por %p52_p6, %p51_p5 }
  0x13   : > { %p74_p8 = scmp.ne.s32.totalorder %s727_s8, %s723_s7  ;;  %s33_s26 = ssub.s32 %s755_s15, %s1075_s20 }
  0x14   : > { %p75_p9 = scmp.eq.s32.totalorder %s459_s17, 9  ;;  %s35_s27 = sor.u32 %s34_s22, %s33_s26 }
  0x15   : > { %p62_p10 = scmp.eq.s32.totalorder %s33_s26, 0  ;;  %p36_p11 = scmp.eq.s32.totalorder %s35_s27, 0 }
  0x16   : > { %p860_p12 = por %p75_p9, %p74_p8  ;;  %p80_p13 = scmp.ne.s32.totalorder %s723_s7, %s719_s6 }
  0x17   : > { %s865_s29 = scalar_select %p62_p10, %s727_s8, %s64_s24  }
  0x18   : > { %s868_s30 = scalar_select %p36_p11, %s739_s11, %s38_s21  }
  0x19   : > { %p81_p0 = scmp.eq.s32.totalorder %s460_s18, 9  ;;  %p462_p2 = scmp.ge.s32.totalorder %s759_s16, 10 }
  0x1b   : > { %p872_p1 = por %p81_p0, %p80_p13  ;;  %97 = sbr.rel (%p462_p2) target bundleno = 72 (0x48), region = 16 }
  0x1d   : > { %s1056_s2 = scalar_select %p872_p1, 1, 0 }
  0x22   : > { %100 = sbr.rel (!%p844_p3) target bundleno = 72 (0x48), region = 20  ;;  %s101_s3 = sand.u32 (%p844_p3), 1, %s739_s11  }
  0x23   : > { %s464_s4 = sshll.u32 (%p844_p3), %s751_s14, 1  ;;  %s463_s5 = sshll.u32 (%p844_p3), %s101_s3, 5 }
  0x24   : > { %s107_s9 = ssub.s32 (%p844_p3), 3, %s464_s4  ;;  %s884_s21 = scalar_lea.sflag (%p844_p3), [#allocation5], %s101_s3 }
  0x25   : > { %p108_p4 = scmp.lt.s32.totalorder (%p844_p3), %s107_s9, 2  ;;  %s105_s22 = scalar_lea.vmem (%p844_p3), [#allocation4], %s463_s5 }
  0x29   : > { %s1077_s9 = smov (!%p108_p4, %s107_s9), 2 }
  0x2a   : > { %s881_s17 = sshll.u32 %s1077_s9, 8 }
  0x2b   : > { %s113_s18 = ssub.s32 512, %s881_s17 }
  0x2c   : > { %114 = vsyncadd %s884_s21, %s113_s18  ;;  %p467_p3 = scmp.ne.s32.totalorder %s881_s17, 0  ;;  %s483_s23 = sshll.u32 %s751_s14, 2 }
  0x2d   : > { %s484_s24 = smul.u32 6, %s755_s15  ;;  %s122_s26 = sshll.u32 %s105_s22, 4  ;;  %s890_s26 = int_to_ptr.vmem [resolvable:$true] %s122_s26 }
  0x2e   : > { %s613_s19 = scalar_lea.hbm %s1047_s0, 3840 }
  0x2f   : > { %s118_s27 = sadd.s32 %s484_s24, %s483_s23 }
  0x30   : > { %s469_s4 = sshll.u32 %s118_s27, 7 }
  0x31   : > { %s895_s3 = scalar_lea.hbm %s1047_s0, %s469_s4 }
  0x32   : > { %s609_s5 = scalar_lea.hbm %s895_s3, %s881_s17  ;;  %p614_p9 = scmp.lt.u32.totalorder %s895_s3, %s1047_s0 }
  0x33   : > { %p610_p5 = scmp.ne.s32.totalorder %s895_s3, %s609_s5  ;;  %p615_p10 = scmp.lt.u32.totalorder %s613_s19, %s609_s5 }
  0x34   : > { %p617_p13 = scmp.lt.u32.totalorder %s609_s5, %s895_s3 }
  0x35   : > { %p611_p6 = pnand %p610_p5, %p467_p3  ;;  %p616_p11 = por %p615_p10, %p614_p9 }
  0x37   : > { %p612_p8 = pneg %p611_p6  ;;  %p618_p0 = por %p617_p13, %p616_p11 }
  0x39   : > { %p619_p2 = pnand %p618_p0, %p612_p8 }
  0x3b   : > { %622 = shalt.err (!%p619_p2)
}
  0x3c   : > { %s623_s20 = scalar_lea.vmem %s890_s26, %s881_s17  ;;  %s761_s27 = smov [#allocation4]  }
  0x3d   : > { %p624_p4 = scmp.ne.s32.totalorder %s890_s26, %s623_s20  ;;  %s627_s4 = sshll.u32 %s761_s27, 4  ;;  %s628_s4 = int_to_ptr.vmem [resolvable:$false] %s627_s4 }
  0x3e   : > { %s629_s9 = scalar_lea.vmem %s628_s4, 1024  ;;  %p630_p1 = scmp.lt.s32.totalorder %s890_s26, %s628_s4 }
  0x3f   : > { %p625_p5 = pnand %p624_p4, %p467_p3  ;;  %p631_p9 = scmp.lt.s32.totalorder %s629_s9, %s623_s20 }
  0x41   : > { %p626_p6 = pneg %p625_p5  ;;  %p632_p10 = por %p631_p9, %p630_p1 }
  0x43   : > { %p633_p11 = pnand %p632_p10, %p626_p6 }
  0x45   : > { %636 = shalt.err (!%p633_p11)
}
  0x46   : > { %s762_s19 = smov 256   ;;  %s763_s5 = smov 16  }
  0x47   : > { %128 = dma.hbm_to_vmem [thread:$0]  (%p467_p3), %s895_s3, %s881_s17, %s890_s26, %s884_s21, %s762_s19, %s762_s19, %s763_s5  }
  0x48 PF: > { %p472_p8 = scmp.ge.s32.totalorder %s759_s16, 1  ;;  %p130_p13 = scmp.lt.s32.totalorder %s759_s16, 11 }
  0x4a   : > { %p131_p0 = pnand %p472_p8, %p130_p13 }
  0x4b   : > { %s136_s18 = sand.u32 (!%p131_p0), 1, %s735_s10  }
  0x4c   : > { %134 = sbr.rel (%p131_p0) target bundleno = 818 (0x332), region = 24  ;;  %s473_s22 = sshll.u32 (!%p131_p0), %s136_s18, 5 }
  0x4d   : > { %s137_s23 = scalar_lea.sflag (!%p131_p0), [#allocation5], %s136_s18  ;;  %s140_s24 = scalar_lea.vmem (!%p131_p0), [#allocation4], %s473_s22 }
  0x53   : > { %710 = dma.done.wait (%p852_p7), %s137_s23, 512  }
  0x54   : > { %712 = vsyncadd (%p852_p7), %s137_s23, 4294966784  ;;  %s156_s17 = sand.u32 1, %s723_s7   ;;  %p475_p1 = scmp.ne.s32.totalorder %s743_s12, 0 }
  0x55   : > { %s932_s21 = sshll.u32 %s156_s17, 3  ;;  %v169_v0 = vlaneseq (!%p475_p1)  ;;  %vm174_vm0 = vcmask (!%p475_p1), 0   ;;  %v764_v1 = vmov (!%p475_p1), 0.0  }
  0x56   : > { %s158_s26 = scalar_lea.vmem [#allocation7], %s932_s21  ;;  %168 = sbr.rel (%p475_p1) target bundleno = 93 (0x5d), region = 32  ;;  %175 = vst.msk [vmem:[#allocation3] sm:$0x1] (!%p475_p1), %vm174_vm0, %v764_v1 }
  0x57   : > { %vm171_vm1 = vcmp.lt.s32.totalorder (!%p475_p1), %v169_v0, 200 }
  0x58   : > { %173 = vst.msk [vmem:[#allocation2] sm:$0x3] (!%p475_p1), %vm171_vm1, %v764_v1 }
  0x5d PF: > { %s476_s25 = sshll.u32 %s743_s12, 4  ;;  %v181_v2 = vlaneseq  ;;  %v176_v5 = vld [vmem:[%s140_s24] sm:$0xff]  ;;  %v177_v6 = vld [vmem:[%s140_s24 + $0x8] sm:$0xff]  ;;  %vm197_vm2 = vcmask 588800   ;;  %v178_v9 = vld [vmem:[%s140_s24 + $0x10] sm:$0xff]  ;;  %vm274_vm5 = vcmask 7168  }
  0x5e   : > { %v184_v3 = vstv %s476_s25  ;;  %v179_v10 = vld [vmem:[%s140_s24 + $0x18] sm:$0xff]  ;;  %vm315_vm7 = vcmask 0   ;;  %p477_p7 = scmp.ne.s32.totalorder %s743_s12, 1 }
  0x5f   : > { %v938_v4 = vshrl.u32 %v181_v2, 7  ;;  %vm309_vm6 = vcmp.lt.s32.totalorder %v181_v2, 200  ;;  %vm339_vm9 = vcmask (!%p477_p7), 1040384   ;;  %vm341_vm10 = vcmask (!%p477_p7), 581632  }
  0x61   : > { %v941_v7 = vadd.s32 %v184_v3, %v938_v4  ;;  %v183_v8 = vadd.s32 8, %v938_v4 }
  0x63   : > { %vm187_vm3 = vcmp.lt.s32.totalorder %v941_v7, 24  ;;  %v945_v11 = vadd.s32 %v184_v3, %v183_v8 }
  0x64   : > { %v193_v12 = vsel %vm187_vm3, %v176_v5, 0.0  ;;  %v194_v13 = vsel %vm187_vm3, %v177_v6, 0.0 }
  0x65   : > { %v198_v14 = vsel %vm197_vm2, %v194_v13, -inf  ;;  %vm188_vm4 = vcmp.lt.s32.totalorder %v945_v11, 24 }
  0x66   : > { %v199_v15 = vmax.f32 %v193_v12, %v198_v14  ;;  %v195_v16 = vsel %vm188_vm4, %v178_v9, 0.0  ;;  %v196_v17 = vsel %vm188_vm4, %v179_v10, 0.0 }
  0x67   : > { %v202_v18 = vsel %vm197_vm2, %v196_v17, -inf }
  0x68   : > { %200 = vmax.xlane.f32.xlu0 %v199_v15  ;;  %v203_v19 = vmax.f32 %v195_v16, %v202_v18 }
  0x6c   : > { %204 = vmax.xlane.f32.xlu0 %v203_v19 }
  0xf5   : > { %v201_v20 = vpop.xlane.xlu0 %200 }
  0xf6   : > { %v206_v21 = vsub.f32 %v193_v12, %v201_v20  ;;  %v207_v22 = vsub.f32 %v194_v13, %v201_v20  ;;  %v765_v20 = vmov 1966171168  }
  0xf8   : > { %v210_v23 = vmul.f32 1.442695, %v206_v21  ;;  %v212_v24 = vmul.f32 1.442695, %v207_v22 }
  0xf9   : > { %v205_v25 = vpop.xlane.xlu0 %204 }
  0xfa   : > { %588 = vpow2.f32 %v210_v23  ;;  %v208_v26 = vsub.f32 %v195_v16, %v205_v25  ;;  %v209_v27 = vsub.f32 %v196_v17, %v205_v25 }
  0xfb   : > { %590 = vpow2.f32 %v212_v24 }
  0xfc   : > { %v214_v28 = vmul.f32 1.442695, %v208_v26  ;;  %v216_v29 = vmul.f32 1.442695, %v209_v27 }
  0xfe   : > { %592 = vpow2.f32 %v214_v28 }
  0xff   : > { %594 = vpow2.f32 %v216_v29 }
 0x104   : > { %v589_v30 = vpop.eup %588 }
 0x105   : > { %v591_v31 = vpop.eup %590  ;;  %v226_v32 = vmul.f32 %v589_v30, %v206_v21  ;;  %v292_v21 = vunpack.c.l.s4 %v765_v20 }
 0x106   : > { %v227_v33 = vmul.f32 %v591_v31, %v207_v22  ;;  %v218_v34 = vsel %vm197_vm2, %v591_v31, 0.0 }
 0x107   : > { %v219_v35 = vadd.f32 %v589_v30, %v218_v34 }
 0x108   : > { %v593_v36 = vpop.eup %592  ;;  %v230_v37 = vsel %vm197_vm2, %v227_v33, 0.0  ;;  %v287_v33 = vld [vmem:[#allocation2] sm:$0x3] }
 0x109   : > { %v595_v38 = vpop.eup %594  ;;  %220 = vadd.xlane.f32.xlu1 %v219_v35  ;;  %v231_v39 = vadd.f32 %v230_v37, %v226_v32  ;;  %v228_v43 = vmul.f32 %v593_v36, %v208_v26  ;;  %v293_v26 = vunpack.c.0.s8 %v292_v21 }
 0x10a   : > { %v229_v40 = vmul.f32 %v595_v38, %v209_v27  ;;  %v222_v41 = vsel %vm197_vm2, %v595_v38, 0.0 }
 0x10b   : > { %232 = vadd.xlane.f32.xlu0 %v231_v39  ;;  %v223_v42 = vadd.f32 %v593_v36, %v222_v41  ;;  %v296_v11 = vsub.s32 %v293_v26, %v938_v4 }
 0x10c   : > { %v234_v44 = vsel %vm197_vm2, %v229_v40, 0.0 }
 0x10d   : > { %224 = vadd.xlane.f32.xlu1 %v223_v42  ;;  %v235_v45 = vadd.f32 %v234_v44, %v228_v43  ;;  %v312_v43 = vld [vmem:[#allocation3] sm:$0x1] }
 0x111   : > { %236 = vadd.xlane.f32.xlu1 %v235_v45 }
 0x196   : > { %v221_v46 = vpop.xlane.xlu1 %220 }
 0x197   : > { %596 = vrcp.f32 %v221_v46 }
 0x198   : > { %598 = vlog2.f32 %v221_v46  ;;  %v233_v49 = vpop.xlane.xlu0 %232 }
 0x19a   : > { %v225_v47 = vpop.xlane.xlu1 %224 }
 0x19b   : > { %600 = vrcp.f32 %v225_v47 }
 0x19c   : > { %602 = vlog2.f32 %v225_v47 }
 0x19e   : > { %v237_v58 = vpop.xlane.xlu1 %236 }
 0x1a1   : > { %v597_v48 = vpop.eup %596 }
 0x1a2   : > { %v599_v50 = vpop.eup %598  ;;  %v249_v51 = vmul.f32 %v597_v48, %v591_v31  ;;  %v244_v52 = vmul.f32 %v597_v48, %v233_v49  ;;  %v248_v54 = vmul.f32 %v597_v48, %v589_v30 }
 0x1a3   : > { %v241_v53 = vmul.f32 0.6931472, %v599_v50  ;;  %v331_v50 = vsub.s32 (!%p477_p7), 0, %v938_v4 }
 0x1a4   : > { %v253_v56 = vsel %vm187_vm3, %v249_v51, 0.0  ;;  %v252_v0 = vsel %vm187_vm3, %v248_v54, 0.0  ;;  %v335_v51 = vsub.s32 (!%p477_p7), 1, %v938_v4 }
 0x1a5   : > { %v601_v55 = vpop.eup %600  ;;  %v246_v57 = vsub.f32 %v244_v52, %v241_v53  ;;  %v263_v1 = vsel %vm197_vm2, %v253_v56, 0.0 }
 0x1a6   : > { %v603_v59 = vpop.eup %602  ;;  %v250_v60 = vmul.f32 %v601_v55, %v593_v36  ;;  %v251_v61 = vmul.f32 %v601_v55, %v595_v38  ;;  %v245_v62 = vmul.f32 %v601_v55, %v237_v58  ;;  %v766_v58 = vmov (!%p477_p7), 0  }
 0x1a7   : > { %v243_v63 = vmul.f32 0.6931472, %v603_v59  ;;  %v272_v10 = vsel %vm187_vm3, %v246_v57, 0.0  ;;  %604 = vset.pattern.permute.xlu0 (!%p477_p7), %v766_v58 }
 0x1a8   : > { %v254_v3 = vsel %vm188_vm4, %v250_v60, 0.0  ;;  %v255_v5 = vsel %vm188_vm4, %v251_v61, 0.0  ;;  %v275_v16 = vsel %vm274_vm5, %v272_v10, 0.0 }
 0x1a9   : > { %v256_v6 = vadd.f32 %v254_v3, %v252_v0  ;;  %v264_v8 = vsel %vm197_vm2, %v255_v5, 0.0  ;;  %v247_v9 = vsub.f32 %v245_v62, %v243_v63 }
 0x1aa   : > { %v265_v12 = vadd.f32 %v264_v8, %v263_v1 }
 0x1ab   : > { %v257_v13 = vrot.slane %v256_v6, 4  ;;  %v273_v14 = vsel %vm188_vm4, %v247_v9, 0.0 }
 0x1ac   : > { %v266_v15 = vrot.slane %v265_v12, 4  ;;  %v276_v17 = vsel %vm274_vm5, %v273_v14, 0.0 }
 0x1ad   : > { %v258_v18 = vadd.f32 %v257_v13, %v256_v6  ;;  %v277_v19 = vadd.f32 %v276_v17, %v275_v16 }
 0x1ae   : > { %v267_v22 = vadd.f32 %v266_v15, %v265_v12 }
 0x1af   : > { %v259_v23 = vrot.slane %v258_v18, 2  ;;  %278 = vadd.xlane.f32.xlu0 %v277_v19 }
 0x1b0   : > { %v268_v24 = vrot.slane %v267_v22, 2 }
 0x1b1   : > { %v260_v25 = vadd.f32 %v259_v23, %v258_v18 }
 0x1b2   : > { %v269_v7 = vadd.f32 %v268_v24, %v267_v22 }
 0x1b3   : > { %v261_v27 = vrot.slane %v260_v25, 1 }
 0x1b4   : > { %v270_v28 = vrot.slane %v269_v7, 1 }
 0x1b5   : > { %v262_v29 = vadd.f32 %v261_v27, %v260_v25 }
 0x1b6   : > { %v271_v30 = vadd.f32 %v270_v28, %v269_v7 }
 0x1b8   : > { %v290_v31 = vcombine.low %v262_v29, %v271_v30 }
 0x1ba   : > { %v297_v32 = vrot.slane %v290_v31, %v296_v11 }
 0x1bc   : > { %v304_v34 = vrot.slane %v297_v32, %v296_v11 }
 0x1be   : > { %v306_v35 = vadd.f32 %v304_v34, %v287_v33 }
 0x1c0   : > { %311 = vst.msk [vmem:[#allocation2] sm:$0x3] %vm309_vm6, %v306_v35 }
 0x1c7   : > { %v321_v2 = vld [vmem:[#allocation2] sm:$0x3] (!%p477_p7) }
 0x1c8   : > { %v322_v46 = vmul.f32 (!%p477_p7), 0.041666668, %v321_v2 }
 0x1ca   : > { %vm323_vm8 = vcmp.gt.f32.partialorder (!%p477_p7), %v322_v46, 0.0 }
 0x1cb   : > { %v324_v47 = vsel (!%p477_p7), %vm323_vm8, %v322_v46, 1.0 }
 0x1cc   : > { %605 = vlog2.f32 (!%p477_p7), %v324_v47 }
 0x1d6   : > { %v606_v48 = vpop.eup (!%p477_p7), %605 }
 0x1d7   : > { %v326_v49 = vmul.f32 (!%p477_p7), 0.6931472, %v606_v48 }
 0x1d9   : > { %v327_v52 = vmul.f32 (!%p477_p7), %v326_v49, %v322_v46 }
 0x1db   : > { %v332_v53 = vrot.slane (!%p477_p7), %v327_v52, %v331_v50  ;;  %v336_v54 = vrot.slane (!%p477_p7), %v327_v52, %v335_v51 }
 0x1dd   : > { %v340_v55 = vsel (!%p477_p7), %vm339_vm9, %v332_v53, 0.0  ;;  %v342_v56 = vsel (!%p477_p7), %vm341_vm10, %v336_v54, 0.0 }
 0x1de   : > { %v343_v57 = vadd.f32 (!%p477_p7), %v342_v56, %v340_v55 }
 0x1e0   : > { %344 = vadd.xlane.f32.xlu0 (!%p477_p7), %v343_v57 }
 0x23c   : > { %v279_v36 = vpop.xlane.xlu0 %278 }
 0x23d   : > { %v280_v37 = vrot.slane %v279_v36, 4 }
 0x23f   : > { %v281_v38 = vadd.f32 %v280_v37, %v279_v36 }
 0x241   : > { %v282_v39 = vrot.slane %v281_v38, 2 }
 0x243   : > { %v283_v40 = vadd.f32 %v282_v39, %v281_v38 }
 0x245   : > { %v284_v41 = vrot.slane %v283_v40, 1 }
 0x247   : > { %v285_v42 = vadd.f32 %v284_v41, %v283_v40 }
 0x249   : > { %485 = vpush %v285_v42 }
 0x26d   : > { %v345_v61 = vpop.xlane.xlu0 (!%p477_p7), %344 }
 0x278   : > { %320 = sbr.rel (%p477_p7) target bundleno = 794 (0x31a), region = 36 }
 0x27a   : > { %s486_s3 = spop %485 }
 0x27b   : > { %v313_v44 = vstv %s486_s3 }
 0x27c   : > { %v314_v45 = vadd.f32 %v313_v44, %v312_v43 }
 0x27e   : > { %316 = vst.msk [vmem:[#allocation3] sm:$0x1] %vm315_vm7, %v314_v45 }
 0x285   : > { %v346_v59 = vld [vmem:[#allocation3] sm:$0x1] }
 0x286   : > { %v347_v60 = vmul.f32 0.041666668, %v346_v59 }
 0x288   : > { %v348_v62 = vsub.f32 %v347_v60, %v345_v61 }
 0x28a   : > { %v349_v63 = vmul.f32 1.442695, %v348_v62 }
 0x28c   : > { %607 = vpow2.f32 %v349_v63 }
 0x296   : > { %v608_v0 = vpop.eup %607 }
 0x297   : > { %v355_v4 = vrot.slane %v608_v0, %v331_v50 }
 0x299   : > { %357 = vperm.xlu0 %604, %v355_v4  }
 0x318   : > { %v358_v1 = vpop.permute.xlu0 %357 }
 0x319   : > { %360 = vst [vmem:[%s158_s26] sm:$0xff] %v358_v1 }
 0x31a PF: > { %s479_s12 = sshll.u32 %s747_s13, 7  ;;  %s375_s9 = sshll.u32 %s158_s26, 4  ;;  %s376_s9 = int_to_ptr.vmem [resolvable:$true] %s375_s9 }
 0x31b   : > { %s987_s4 = scalar_lea.hbm %s1048_s1, %s479_s12  ;;  %s362_s19 = scalar_lea.sflag [#allocation6], %s156_s17 }
 0x31c   : > { %s637_s5 = scalar_lea.vmem %s376_s9, 128  ;;  %s767_s18 = smov [#allocation7]  }
 0x31d   : > { %p638_p3 = scmp.ne.s32.totalorder %s376_s9, %s637_s5  ;;  %s641_s22 = sshll.u32 %s767_s18, 4  ;;  %s642_s22 = int_to_ptr.vmem [resolvable:$false] %s641_s22 }
 0x31e   : > { %s643_s23 = scalar_lea.vmem %s642_s22, 256  ;;  %p644_p5 = scmp.lt.s32.totalorder %s376_s9, %s642_s22 }
 0x31f   : > { %p639_p2 = pnand %p638_p3, %p860_p12  ;;  %p645_p6 = scmp.lt.s32.totalorder %s643_s23, %s637_s5 }
 0x321   : > { %p640_p4 = pneg %p639_p2  ;;  %p646_p9 = por %p645_p6, %p644_p5 }
 0x323   : > { %p647_p10 = pnand %p646_p9, %p640_p4 }
 0x325   : > { %650 = shalt.err (!%p647_p10)
}
 0x326   : > { %s651_s13 = scalar_lea.hbm %s987_s4, 128  ;;  %s655_s21 = scalar_lea.hbm %s1048_s1, 640 }
 0x327   : > { %p652_p11 = scmp.ne.s32.totalorder %s987_s4, %s651_s13  ;;  %p656_p0 = scmp.lt.u32.totalorder %s987_s4, %s1048_s1 }
 0x328   : > { %p657_p1 = scmp.lt.u32.totalorder %s655_s21, %s651_s13  ;;  %p659_p3 = scmp.lt.u32.totalorder %s651_s13, %s987_s4 }
 0x329   : > { %p653_p8 = pnand %p652_p11, %p860_p12 }
 0x32a   : > { %p658_p7 = por %p657_p1, %p656_p0 }
 0x32b   : > { %p654_p13 = pneg %p653_p8 }
 0x32c   : > { %p660_p2 = por %p659_p3, %p658_p7 }
 0x32e   : > { %p661_p4 = pnand %p660_p2, %p654_p13 }
 0x330   : > { %664 = shalt.err (!%p661_p4)
}
 0x331   : > { %488 = dma.vmem_to_hbm [thread:$0]  (%p860_p12), %s376_s9, 128, %s987_s4, %s362_s19  }
 0x332 PF: > { %p494_p5 = scmp.ge.s32.totalorder %s759_s16, 2  ;;  %s387_s3 = sand.u32 1, %s719_s6  }
 0x333   : > { %p1057_p6 = scmp.ne.s32.totalorder %s1056_s2, 0  ;;  %s388_s12 = scalar_lea.sflag [#allocation6], %s387_s3 }
 0x335   : > { %p491_p9 = pnand %p494_p5, %p1057_p6 }
 0x337   : > { %714 = dma.done.wait (!%p491_p9), %s388_s12, 128  }
 0x338   : > { %716 = vsyncadd (!%p491_p9), %s388_s12, 4294967168  ;;  %s17_s16 = sadd.s32 1, %s759_s16   ;;  %s1058_s28 = sld [smem:[#allocation10_spill]] }
 0x339   : > { %p14_p10 = scmp.ge.s32.totalorder %s17_s16, 12   ;;  %s1059_s20 = sld [smem:[#allocation11_spill]] }
 0x33a   : > { %s1060_s6 = smov %s723_s7  ;;  %s1061_s7 = smov %s727_s8 }
 0x33b   : > { %s1062_s8 = smov %s865_s29  ;;  %s1063_s9 = smov %s735_s10 }
 0x33c   : > { %s1064_s10 = smov %s739_s11  ;;  %s1065_s11 = smov %s868_s30 }
 0x33d   : > { %s1066_s12 = smov %s751_s14  ;;  %s1067_s13 = smov %s755_s15 }
 0x33e   : > { %s1068_s14 = smov %s1058_s28  ;;  %16 = sbr.rel (!%p14_p10) target bundleno = 9 (0x9), region = 77 }
 0x33f   : > { %s1069_s15 = smov %s1059_s20 }
 0x345   :  { %393 = vsyncpa [#allocation5], 1 }
 0x346   :  { %395 = vsyncpa [#allocation5 + $0x1], 1 }
 0x347   :  { %396 = vsyncpa [#allocation6], 1 }
 0x348   :  { %398 = vsyncpa [#allocation6 + $0x1], 1 }

</bundles_post_ra>
